<compile_context>
chip_gen: v5e
topology: v5e:2x2
jax: 0.10.0
libtpu: 0.0.40
codegen_flags: <defaults>
</compile_context>

<pallas_src>
import jax
import jax.numpy as jnp
from jax.experimental import pallas as pl
from jax.experimental.pallas import tpu as pltpu

POOL_K = 3  # MaxPool2d kernel_size (module default), stride = 1

# Per-block VMEM budget for the (input + output) tiles of one grid step.
# TODO(synk): on v6e/v5e (128 MiB physical VMEM) this and the vmem limit can be
# raised 2-4x; 8 MiB (x2 for double buffering) is sized for v7x's 64 MiB.
_BLOCK_BUDGET_BYTES = 8 << 20
_MXU_MIN_C1 = 16  # below this the unrolled VPU path beats feeding the MXU


# ---------------------------------------------------------------------------
# In-kernel helper: separable 3x3 stride-1 max pool via XLU rotations
# ---------------------------------------------------------------------------
def _maxpool3x3_same(x):
    """Separable 3x3/s1 max pool with wrap-around borders.

    Element [..., i, j] of the result equals max(x[..., i-1:i+2, j-1:j+2]) for
    1 <= i <= H-2 and 1 <= j <= W-2 (the symmetric use of shift=1 and
    shift=n-1 makes this independent of the rotate direction convention).
    Border rows/cols contain wrapped garbage and are sliced off by the caller.
    """
    h_ax, w_ax = x.ndim - 2, x.ndim - 1
    H, W = x.shape[h_ax], x.shape[w_ax]
    # Width direction (lane axis): 2 rotations + 2 maxes.
    m = jnp.maximum(x, pltpu.roll(x, 1, w_ax))
    m = jnp.maximum(m, pltpu.roll(x, W - 1, w_ax))
    # Height direction (sublane axis): 2 rotations + 2 maxes.
    p = jnp.maximum(m, pltpu.roll(m, 1, h_ax))
    p = jnp.maximum(p, pltpu.roll(m, H - 1, h_ax))
    return p


# ---------------------------------------------------------------------------
# Kernels
# ---------------------------------------------------------------------------
def _pool_kernel(x_ref, o_ref):
    # Pool-only path (c1 == c2: DownSample skips conv1).
    o_ref[...] = _maxpool3x3_same(x_ref[...]).astype(o_ref.dtype)


def _pool_conv_vpu_kernel(x_ref, w_ref, b_ref, o_ref):
    # x_ref: (B, C1, H, W) VMEM
    # w_ref: (C2, C1)      SMEM, BN scale already folded in (f32)
    # b_ref: (C2,)         SMEM, folded BN bias (f32)
    # o_ref: (B, C2, H, W) VMEM
    C2 = o_ref.shape[1]
    C1 = x_ref.shape[1]

    pooled = _maxpool3x3_same(x_ref[...])          # (B, C1, H, W), stays on-chip

    # 1x1 conv as scalar-weight VPU FMAs (tiny channel counts -> skip the MXU).
    for c2 in range(C2):
        acc = w_ref[c2, 0] * pooled[:, 0]          # init with first product (f32)
        for c1 in range(1, C1):
            acc = acc + w_ref[c2, c1] * pooled[:, c1]
        o_ref[:, c2] = jnp.maximum(acc + b_ref[c2], 0.0).astype(o_ref.dtype)


def _pool_conv_mxu_kernel(x_ref, w_ref, b_ref, o_ref):
    # MXU path for real channel counts (C1 >= _MXU_MIN_C1).
    # x_ref: (B, C1, H, W) VMEM
    # w_ref: (C2, C1)      VMEM f32 (BN scale folded in)
    # b_ref: (C2, 1)       VMEM f32
    # o_ref: (B, C2, H, W) VMEM
    B, C2, H, W = o_ref.shape
    C1 = x_ref.shape[1]

    pooled = _maxpool3x3_same(x_ref[...])
    w = w_ref[...]
    b = b_ref[...]
    for bi in range(B):
        # TODO(synk): this reshape can force a relayout when W is not
        # 128-aligned; if it shows up in profiles, switch to per-row-strip
        # matmuls instead of flattening (H, W).
        mat = pooled[bi].reshape(C1, H * W).astype(jnp.float32)
        y = jnp.dot(w, mat, preferred_element_type=jnp.float32)   # (C2, H*W)
        y = jnp.maximum(y + b, 0.0)
        o_ref[bi] = y.reshape(C2, H, W).astype(o_ref.dtype)


# ---------------------------------------------------------------------------
# Wrapper
# ---------------------------------------------------------------------------
def _pick_batch_tile(n, per_image_bytes):
    """Largest divisor of n that fits the VMEM budget, capped so the parallel
    grid keeps >= ~4 steps (2 TensorCores on v7x + pipeline depth)."""
    fit = max(1, min(n, _BLOCK_BUDGET_BYTES // max(per_image_bytes, 1)))
    target = max(1, -(-n // 4))          # aim for >= 4 grid steps when possible
    bt = max(1, min(fit, target))
    while n % bt:
        bt -= 1
    return bt


def downsample_forward(x, w=None, scale=None, bias=None):
    """DownSample forward.  x: (N, C1, H, W) NCHW (f32 or bf16).

    If (w, scale, bias) are given (c1 != c2 in the module), applies
    MaxPool2d(3,1,ceil) -> 1x1 Conv (no bias) -> BatchNorm (eval-mode, folded)
    -> ReLU.  Otherwise returns just the max-pool.  Output dtype == x.dtype.
    """
    N, C1, H, W = x.shape
    if H < POOL_K or W < POOL_K:
        # PyTorch MaxPool2d(3, 1, ceil_mode=True) errors on these shapes too.
        raise ValueError("DownSample requires H >= 3 and W >= 3")
    Ho, Wo = H - (POOL_K - 1), W - (POOL_K - 1)
    C2 = C1 if w is None else w.shape[0]

    itemsize = jnp.dtype(x.dtype).itemsize
    per_img = (C1 + C2) * H * W * itemsize
    bt = _pick_batch_tile(N, per_img)
    grid = (N // bt,)

    in_block = bt * C1 * H * W * itemsize
    out_block = bt * C2 * H * W * itemsize
    need = 2 * (in_block + out_block) + (2 << 20)       # double-buffered + slack
    vmem_limit = int(min(max(need, 32 << 20), 64 << 20))  # valid on v5e/v6e/v7x

    cparams = pltpu.CompilerParams(
        dimension_semantics=("parallel",),
        vmem_limit_bytes=vmem_limit,
    )
    x_spec = pl.BlockSpec((bt, C1, H, W), lambda n: (n, 0, 0, 0))
    o_spec = pl.BlockSpec((bt, C2, H, W), lambda n: (n, 0, 0, 0))
    # Full (H, W) output slab; valid pooled region is [1:H-1, 1:W-1] (sliced
    # below, outside the kernel, so in-kernel stores stay lane-dense).
    out_shape = jax.ShapeDtypeStruct((N, C2, H, W), x.dtype)

    if w is None:
        full = pl.pallas_call(
            _pool_kernel,
            out_shape=out_shape,
            grid_spec=pltpu.PrefetchScalarGridSpec(
                num_scalar_prefetch=0,
                grid=grid,
                in_specs=[x_spec],
                out_specs=o_spec,
            ),
            compiler_params=cparams,
        )(x)
        return full[..., 1:H - 1, 1:W - 1]

    # Fold BN scale into the conv weights (exact: BN is affine, conv has no
    # bias).  Eval-mode (running stats) only.
    w_eff = (w * scale[:, None]).astype(jnp.float32)     # (C2, C1)
    b_eff = bias.astype(jnp.float32)                     # (C2,)

    if C1 >= _MXU_MIN_C1:
        kernel = _pool_conv_mxu_kernel
        w_spec = pl.BlockSpec((C2, C1), lambda n: (0, 0))          # VMEM
        b_spec = pl.BlockSpec((C2, 1), lambda n: (0, 0))           # VMEM
        b_arg = b_eff[:, None]
    else:
        kernel = _pool_conv_vpu_kernel
        w_spec = pl.BlockSpec(memory_space=pltpu.MemorySpace.SMEM)  # scalars
        b_spec = pl.BlockSpec(memory_space=pltpu.MemorySpace.SMEM)
        b_arg = b_eff

    full = pl.pallas_call(
        kernel,
        out_shape=out_shape,
        grid_spec=pltpu.PrefetchScalarGridSpec(
            num_scalar_prefetch=0,
            grid=grid,
            in_specs=[x_spec, w_spec, b_spec],
            out_specs=o_spec,
        ),
        compiler_params=cparams,
    )(x, w_eff, b_arg)
    return full[..., 1:H - 1, 1:W - 1]


# ---------------------------------------------------------------------------
# Deterministic synthetic parameters (1x1 conv weight + BatchNorm, eval mode)
# ---------------------------------------------------------------------------
def init_downsample_params(key, c1, c2, eps=1e-5):
    ks = jax.random.split(key, 5)
    # PyTorch conv weight shape (c2, c1, 1, 1) -> squeezed (c2, c1)
    w = jax.random.normal(ks[0], (c2, c1), jnp.float32) * 0.1
    gamma = 1.0 + 0.1 * jax.random.normal(ks[1], (c2,), jnp.float32)
    beta = 0.1 * jax.random.normal(ks[2], (c2,), jnp.float32)
    mean = 0.1 * jax.random.normal(ks[3], (c2,), jnp.float32)
    var = jnp.abs(jax.random.normal(ks[4], (c2,), jnp.float32)) + 0.5
    scale = gamma / jnp.sqrt(var + eps)
    bias = beta - mean * scale
    return dict(w=w, scale=scale, bias=bias)


if __name__ == "__main__":
    key = jax.random.PRNGKey(0)
    kx, kp = jax.random.split(key)

    N, C1, H, W = 2, 4, 16, 16
    C2 = 8  # c1 != c2 -> conv1 branch is active
    x = jax.random.normal(kx, (N, C1, H, W), jnp.float32)
    params = init_downsample_params(kp, C1, C2)

    fwd = jax.jit(
        lambda x, p: downsample_forward(x, p["w"], p["scale"], p["bias"]))
    out = jax.block_until_ready(fwd(x, params))
    assert out.shape == (N, C2, H - 2, W - 2), out.shape
    assert out.dtype == x.dtype, out.dtype

    # Pure-JAX reference: MaxPool2d(3,1,ceil) + 1x1 conv + BN + ReLU.
    pooled_ref = jax.lax.reduce_window(
        x, -jnp.inf, jax.lax.max, (1, 1, POOL_K, POOL_K), (1, 1, 1, 1), "VALID")
    conv_ref = jnp.einsum("oc,nchw->nohw", params["w"], pooled_ref)
    ref = jnp.maximum(
        conv_ref * params["scale"][None, :, None, None]
        + params["bias"][None, :, None, None], 0.0)
    assert jnp.allclose(out, ref, rtol=1e-4, atol=1e-4), float(
        jnp.max(jnp.abs(out - ref)))

    # Pool-only path (corresponds to c1 == c2 in the module).
    out_pool = jax.block_until_ready(jax.jit(downsample_forward)(x))
    assert out_pool.shape == (N, C1, H - 2, W - 2)
    assert out_pool.dtype == x.dtype
    assert jnp.allclose(out_pool, pooled_ref)

    print("KERNEL_OK")
</pallas_src>

<mosaic_0001>
module attributes {stable_mosaic.version = 11 : i64} {
  func.func @_pool_conv_vpu_kernel(%arg0: i32, %arg1: memref<1x4x16x16xf32, #tpu.memory_space<vmem>>, %arg2: memref<8x4xf32, #tpu.memory_space<smem>>, %arg3: memref<8xf32, #tpu.memory_space<smem>>, %arg4: memref<1x8x16x16xf32, #tpu.memory_space<vmem>>) attributes {dimension_semantics = [#tpu.dimension_semantics<parallel>], iteration_bounds = array<i64: 2>, scalar_prefetch = 0 : i64, scratch_operands = 0 : i64, tpu.core_type = #tpu.core_type<tc>, window_params = [{transform_indices = @transform_0, window_bounds = array<i64: 1, 4, 16, 16>}, {transform_indices = @transform_1, window_bounds = array<i64: 8, 4>}, {transform_indices = @transform_2, window_bounds = array<i64: 8>}, {transform_indices = @transform_3, window_bounds = array<i64: 1, 8, 16, 16>}]} {
    %c0 = arith.constant 0 : index
    %c0_0 = arith.constant 0 : index
    %c0_1 = arith.constant 0 : index
    %c0_2 = arith.constant 0 : index
    %0 = vector.load %arg1[%c0, %c0_0, %c0_1, %c0_2] : memref<1x4x16x16xf32, #tpu.memory_space<vmem>>, vector<1x4x16x16xf32>
    %c1_i32 = arith.constant 1 : i32
    %1 = tpu.dynamic_rotate %0 by %c1_i32 dim 3 : vector<1x4x16x16xf32>, i32 -> vector<1x4x16x16xf32>
    %2 = arith.maximumf %0, %1 : vector<1x4x16x16xf32>
    %c15_i32 = arith.constant 15 : i32
    %3 = tpu.dynamic_rotate %0 by %c15_i32 dim 3 : vector<1x4x16x16xf32>, i32 -> vector<1x4x16x16xf32>
    %4 = arith.maximumf %2, %3 : vector<1x4x16x16xf32>
    %c1_i32_3 = arith.constant 1 : i32
    %5 = tpu.dynamic_rotate %4 by %c1_i32_3 dim 2 : vector<1x4x16x16xf32>, i32 -> vector<1x4x16x16xf32>
    %6 = arith.maximumf %4, %5 : vector<1x4x16x16xf32>
    %c15_i32_4 = arith.constant 15 : i32
    %7 = tpu.dynamic_rotate %4 by %c15_i32_4 dim 2 : vector<1x4x16x16xf32>, i32 -> vector<1x4x16x16xf32>
    %8 = arith.maximumf %6, %7 : vector<1x4x16x16xf32>
    %c0_5 = arith.constant 0 : index
    %c0_6 = arith.constant 0 : index
    %9 = memref.load %arg2[%c0_5, %c0_6] : memref<8x4xf32, #tpu.memory_space<smem>>
    %10 = vector.extract_strided_slice %8 {offsets = [0, 0, 0, 0], sizes = [1, 1, 16, 16], strides = [1, 1, 1, 1]} : vector<1x4x16x16xf32> to vector<1x1x16x16xf32>
    %11 = vector.shape_cast %10 : vector<1x1x16x16xf32> to vector<1x16x16xf32>
    %12 = vector.broadcast %9 : f32 to vector<1x16x16xf32>
    %13 = arith.mulf %12, %11 : vector<1x16x16xf32>
    %c0_7 = arith.constant 0 : index
    %c1 = arith.constant 1 : index
    %14 = memref.load %arg2[%c0_7, %c1] : memref<8x4xf32, #tpu.memory_space<smem>>
    %15 = vector.extract_strided_slice %8 {offsets = [0, 1, 0, 0], sizes = [1, 1, 16, 16], strides = [1, 1, 1, 1]} : vector<1x4x16x16xf32> to vector<1x1x16x16xf32>
    %16 = vector.shape_cast %15 : vector<1x1x16x16xf32> to vector<1x16x16xf32>
    %17 = vector.broadcast %14 : f32 to vector<1x16x16xf32>
    %18 = arith.mulf %17, %16 : vector<1x16x16xf32>
    %19 = arith.addf %13, %18 : vector<1x16x16xf32>
    %c0_8 = arith.constant 0 : index
    %c2 = arith.constant 2 : index
    %20 = memref.load %arg2[%c0_8, %c2] : memref<8x4xf32, #tpu.memory_space<smem>>
    %21 = vector.extract_strided_slice %8 {offsets = [0, 2, 0, 0], sizes = [1, 1, 16, 16], strides = [1, 1, 1, 1]} : vector<1x4x16x16xf32> to vector<1x1x16x16xf32>
    %22 = vector.shape_cast %21 : vector<1x1x16x16xf32> to vector<1x16x16xf32>
    %23 = vector.broadcast %20 : f32 to vector<1x16x16xf32>
    %24 = arith.mulf %23, %22 : vector<1x16x16xf32>
    %25 = arith.addf %19, %24 : vector<1x16x16xf32>
    %c0_9 = arith.constant 0 : index
    %c3 = arith.constant 3 : index
    %26 = memref.load %arg2[%c0_9, %c3] : memref<8x4xf32, #tpu.memory_space<smem>>
    %27 = vector.extract_strided_slice %8 {offsets = [0, 3, 0, 0], sizes = [1, 1, 16, 16], strides = [1, 1, 1, 1]} : vector<1x4x16x16xf32> to vector<1x1x16x16xf32>
    %28 = vector.shape_cast %27 : vector<1x1x16x16xf32> to vector<1x16x16xf32>
    %29 = vector.broadcast %26 : f32 to vector<1x16x16xf32>
    %30 = arith.mulf %29, %28 : vector<1x16x16xf32>
    %31 = arith.addf %25, %30 : vector<1x16x16xf32>
    %c0_10 = arith.constant 0 : index
    %32 = memref.load %arg3[%c0_10] : memref<8xf32, #tpu.memory_space<smem>>
    %33 = vector.broadcast %32 : f32 to vector<1x16x16xf32>
    %34 = arith.addf %31, %33 : vector<1x16x16xf32>
    %cst = arith.constant 0.000000e+00 : f32
    %35 = vector.broadcast %cst : f32 to vector<1x16x16xf32>
    %36 = arith.maximumf %34, %35 : vector<1x16x16xf32>
    %c0_11 = arith.constant 0 : index
    %c0_12 = arith.constant 0 : index
    %c0_13 = arith.constant 0 : index
    %c0_14 = arith.constant 0 : index
    %37 = vector.load %arg4[%c0_11, %c0_12, %c0_13, %c0_14] : memref<1x8x16x16xf32, #tpu.memory_space<vmem>>, vector<1x1x16x16xf32>
    %38 = vector.shape_cast %37 : vector<1x1x16x16xf32> to vector<1x16x16xf32>
    %39 = vector.shape_cast %36 : vector<1x16x16xf32> to vector<1x1x16x16xf32>
    tpu.vector_store %arg4[%c0_11, %c0_12, %c0_13, %c0_14], %39 {strides = array<i32>} : memref<1x8x16x16xf32, #tpu.memory_space<vmem>>, vector<1x1x16x16xf32>,
    %c1_15 = arith.constant 1 : index
    %c0_16 = arith.constant 0 : index
    %40 = memref.load %arg2[%c1_15, %c0_16] : memref<8x4xf32, #tpu.memory_space<smem>>
    %41 = vector.extract_strided_slice %8 {offsets = [0, 0, 0, 0], sizes = [1, 1, 16, 16], strides = [1, 1, 1, 1]} : vector<1x4x16x16xf32> to vector<1x1x16x16xf32>
    %42 = vector.shape_cast %41 : vector<1x1x16x16xf32> to vector<1x16x16xf32>
    %43 = vector.broadcast %40 : f32 to vector<1x16x16xf32>
    %44 = arith.mulf %43, %42 : vector<1x16x16xf32>
    %c1_17 = arith.constant 1 : index
    %c1_18 = arith.constant 1 : index
    %45 = memref.load %arg2[%c1_17, %c1_18] : memref<8x4xf32, #tpu.memory_space<smem>>
    %46 = vector.extract_strided_slice %8 {offsets = [0, 1, 0, 0], sizes = [1, 1, 16, 16], strides = [1, 1, 1, 1]} : vector<1x4x16x16xf32> to vector<1x1x16x16xf32>
    %47 = vector.shape_cast %46 : vector<1x1x16x16xf32> to vector<1x16x16xf32>
    %48 = vector.broadcast %45 : f32 to vector<1x16x16xf32>
    %49 = arith.mulf %48, %47 : vector<1x16x16xf32>
    %50 = arith.addf %44, %49 : vector<1x16x16xf32>
    %c1_19 = arith.constant 1 : index
    %c2_20 = arith.constant 2 : index
    %51 = memref.load %arg2[%c1_19, %c2_20] : memref<8x4xf32, #tpu.memory_space<smem>>
    %52 = vector.extract_strided_slice %8 {offsets = [0, 2, 0, 0], sizes = [1, 1, 16, 16], strides = [1, 1, 1, 1]} : vector<1x4x16x16xf32> to vector<1x1x16x16xf32>
    %53 = vector.shape_cast %52 : vector<1x1x16x16xf32> to vector<1x16x16xf32>
    %54 = vector.broadcast %51 : f32 to vector<1x16x16xf32>
    %55 = arith.mulf %54, %53 : vector<1x16x16xf32>
    %56 = arith.addf %50, %55 : vector<1x16x16xf32>
    %c1_21 = arith.constant 1 : index
    %c3_22 = arith.constant 3 : index
    %57 = memref.load %arg2[%c1_21, %c3_22] : memref<8x4xf32, #tpu.memory_space<smem>>
    %58 = vector.extract_strided_slice %8 {offsets = [0, 3, 0, 0], sizes = [1, 1, 16, 16], strides = [1, 1, 1, 1]} : vector<1x4x16x16xf32> to vector<1x1x16x16xf32>
    %59 = vector.shape_cast %58 : vector<1x1x16x16xf32> to vector<1x16x16xf32>
    %60 = vector.broadcast %57 : f32 to vector<1x16x16xf32>
    %61 = arith.mulf %60, %59 : vector<1x16x16xf32>
    %62 = arith.addf %56, %61 : vector<1x16x16xf32>
    %c1_23 = arith.constant 1 : index
    %63 = memref.load %arg3[%c1_23] : memref<8xf32, #tpu.memory_space<smem>>
    %64 = vector.broadcast %63 : f32 to vector<1x16x16xf32>
    %65 = arith.addf %62, %64 : vector<1x16x16xf32>
    %cst_24 = arith.constant 0.000000e+00 : f32
    %66 = vector.broadcast %cst_24 : f32 to vector<1x16x16xf32>
    %67 = arith.maximumf %65, %66 : vector<1x16x16xf32>
    %c0_25 = arith.constant 0 : index
    %c1_26 = arith.constant 1 : index
    %c0_27 = arith.constant 0 : index
    %c0_28 = arith.constant 0 : index
    %68 = vector.load %arg4[%c0_25, %c1_26, %c0_27, %c0_28] : memref<1x8x16x16xf32, #tpu.memory_space<vmem>>, vector<1x1x16x16xf32>
    %69 = vector.shape_cast %68 : vector<1x1x16x16xf32> to vector<1x16x16xf32>
    %70 = vector.shape_cast %67 : vector<1x16x16xf32> to vector<1x1x16x16xf32>
    tpu.vector_store %arg4[%c0_25, %c1_26, %c0_27, %c0_28], %70 {strides = array<i32>} : memref<1x8x16x16xf32, #tpu.memory_space<vmem>>, vector<1x1x16x16xf32>,
    %c2_29 = arith.constant 2 : index
    %c0_30 = arith.constant 0 : index
    %71 = memref.load %arg2[%c2_29, %c0_30] : memref<8x4xf32, #tpu.memory_space<smem>>
    %72 = vector.extract_strided_slice %8 {offsets = [0, 0, 0, 0], sizes = [1, 1, 16, 16], strides = [1, 1, 1, 1]} : vector<1x4x16x16xf32> to vector<1x1x16x16xf32>
    %73 = vector.shape_cast %72 : vector<1x1x16x16xf32> to vector<1x16x16xf32>
    %74 = vector.broadcast %71 : f32 to vector<1x16x16xf32>
    %75 = arith.mulf %74, %73 : vector<1x16x16xf32>
    %c2_31 = arith.constant 2 : index
    %c1_32 = arith.constant 1 : index
    %76 = memref.load %arg2[%c2_31, %c1_32] : memref<8x4xf32, #tpu.memory_space<smem>>
    %77 = vector.extract_strided_slice %8 {offsets = [0, 1, 0, 0], sizes = [1, 1, 16, 16], strides = [1, 1, 1, 1]} : vector<1x4x16x16xf32> to vector<1x1x16x16xf32>
    %78 = vector.shape_cast %77 : vector<1x1x16x16xf32> to vector<1x16x16xf32>
    %79 = vector.broadcast %76 : f32 to vector<1x16x16xf32>
    %80 = arith.mulf %79, %78 : vector<1x16x16xf32>
    %81 = arith.addf %75, %80 : vector<1x16x16xf32>
    %c2_33 = arith.constant 2 : index
    %c2_34 = arith.constant 2 : index
    %82 = memref.load %arg2[%c2_33, %c2_34] : memref<8x4xf32, #tpu.memory_space<smem>>
    %83 = vector.extract_strided_slice %8 {offsets = [0, 2, 0, 0], sizes = [1, 1, 16, 16], strides = [1, 1, 1, 1]} : vector<1x4x16x16xf32> to vector<1x1x16x16xf32>
    %84 = vector.shape_cast %83 : vector<1x1x16x16xf32> to vector<1x16x16xf32>
    %85 = vector.broadcast %82 : f32 to vector<1x16x16xf32>
    %86 = arith.mulf %85, %84 : vector<1x16x16xf32>
    %87 = arith.addf %81, %86 : vector<1x16x16xf32>
    %c2_35 = arith.constant 2 : index
    %c3_36 = arith.constant 3 : index
    %88 = memref.load %arg2[%c2_35, %c3_36] : memref<8x4xf32, #tpu.memory_space<smem>>
    %89 = vector.extract_strided_slice %8 {offsets = [0, 3, 0, 0], sizes = [1, 1, 16, 16], strides = [1, 1, 1, 1]} : vector<1x4x16x16xf32> to vector<1x1x16x16xf32>
    %90 = vector.shape_cast %89 : vector<1x1x16x16xf32> to vector<1x16x16xf32>
    %91 = vector.broadcast %88 : f32 to vector<1x16x16xf32>
    %92 = arith.mulf %91, %90 : vector<1x16x16xf32>
    %93 = arith.addf %87, %92 : vector<1x16x16xf32>
    %c2_37 = arith.constant 2 : index
    %94 = memref.load %arg3[%c2_37] : memref<8xf32, #tpu.memory_space<smem>>
    %95 = vector.broadcast %94 : f32 to vector<1x16x16xf32>
    %96 = arith.addf %93, %95 : vector<1x16x16xf32>
    %cst_38 = arith.constant 0.000000e+00 : f32
    %97 = vector.broadcast %cst_38 : f32 to vector<1x16x16xf32>
    %98 = arith.maximumf %96, %97 : vector<1x16x16xf32>
    %c0_39 = arith.constant 0 : index
    %c2_40 = arith.constant 2 : index
    %c0_41 = arith.constant 0 : index
    %c0_42 = arith.constant 0 : index
    %99 = vector.load %arg4[%c0_39, %c2_40, %c0_41, %c0_42] : memref<1x8x16x16xf32, #tpu.memory_space<vmem>>, vector<1x1x16x16xf32>
    %100 = vector.shape_cast %99 : vector<1x1x16x16xf32> to vector<1x16x16xf32>
    %101 = vector.shape_cast %98 : vector<1x16x16xf32> to vector<1x1x16x16xf32>
    tpu.vector_store %arg4[%c0_39, %c2_40, %c0_41, %c0_42], %101 {strides = array<i32>} : memref<1x8x16x16xf32, #tpu.memory_space<vmem>>, vector<1x1x16x16xf32>,
    %c3_43 = arith.constant 3 : index
    %c0_44 = arith.constant 0 : index
    %102 = memref.load %arg2[%c3_43, %c0_44] : memref<8x4xf32, #tpu.memory_space<smem>>
    %103 = vector.extract_strided_slice %8 {offsets = [0, 0, 0, 0], sizes = [1, 1, 16, 16], strides = [1, 1, 1, 1]} : vector<1x4x16x16xf32> to vector<1x1x16x16xf32>
    %104 = vector.shape_cast %103 : vector<1x1x16x16xf32> to vector<1x16x16xf32>
    %105 = vector.broadcast %102 : f32 to vector<1x16x16xf32>
    %106 = arith.mulf %105, %104 : vector<1x16x16xf32>
    %c3_45 = arith.constant 3 : index
    %c1_46 = arith.constant 1 : index
    %107 = memref.load %arg2[%c3_45, %c1_46] : memref<8x4xf32, #tpu.memory_space<smem>>
    %108 = vector.extract_strided_slice %8 {offsets = [0, 1, 0, 0], sizes = [1, 1, 16, 16], strides = [1, 1, 1, 1]} : vector<1x4x16x16xf32> to vector<1x1x16x16xf32>
    %109 = vector.shape_cast %108 : vector<1x1x16x16xf32> to vector<1x16x16xf32>
    %110 = vector.broadcast %107 : f32 to vector<1x16x16xf32>
    %111 = arith.mulf %110, %109 : vector<1x16x16xf32>
    %112 = arith.addf %106, %111 : vector<1x16x16xf32>
    %c3_47 = arith.constant 3 : index
    %c2_48 = arith.constant 2 : index
    %113 = memref.load %arg2[%c3_47, %c2_48] : memref<8x4xf32, #tpu.memory_space<smem>>
    %114 = vector.extract_strided_slice %8 {offsets = [0, 2, 0, 0], sizes = [1, 1, 16, 16], strides = [1, 1, 1, 1]} : vector<1x4x16x16xf32> to vector<1x1x16x16xf32>
    %115 = vector.shape_cast %114 : vector<1x1x16x16xf32> to vector<1x16x16xf32>
    %116 = vector.broadcast %113 : f32 to vector<1x16x16xf32>
    %117 = arith.mulf %116, %115 : vector<1x16x16xf32>
    %118 = arith.addf %112, %117 : vector<1x16x16xf32>
    %c3_49 = arith.constant 3 : index
    %c3_50 = arith.constant 3 : index
    %119 = memref.load %arg2[%c3_49, %c3_50] : memref<8x4xf32, #tpu.memory_space<smem>>
    %120 = vector.extract_strided_slice %8 {offsets = [0, 3, 0, 0], sizes = [1, 1, 16, 16], strides = [1, 1, 1, 1]} : vector<1x4x16x16xf32> to vector<1x1x16x16xf32>
    %121 = vector.shape_cast %120 : vector<1x1x16x16xf32> to vector<1x16x16xf32>
    %122 = vector.broadcast %119 : f32 to vector<1x16x16xf32>
    %123 = arith.mulf %122, %121 : vector<1x16x16xf32>
    %124 = arith.addf %118, %123 : vector<1x16x16xf32>
    %c3_51 = arith.constant 3 : index
    %125 = memref.load %arg3[%c3_51] : memref<8xf32, #tpu.memory_space<smem>>
    %126 = vector.broadcast %125 : f32 to vector<1x16x16xf32>
    %127 = arith.addf %124, %126 : vector<1x16x16xf32>
    %cst_52 = arith.constant 0.000000e+00 : f32
    %128 = vector.broadcast %cst_52 : f32 to vector<1x16x16xf32>
    %129 = arith.maximumf %127, %128 : vector<1x16x16xf32>
    %c0_53 = arith.constant 0 : index
    %c3_54 = arith.constant 3 : index
    %c0_55 = arith.constant 0 : index
    %c0_56 = arith.constant 0 : index
    %130 = vector.load %arg4[%c0_53, %c3_54, %c0_55, %c0_56] : memref<1x8x16x16xf32, #tpu.memory_space<vmem>>, vector<1x1x16x16xf32>
    %131 = vector.shape_cast %130 : vector<1x1x16x16xf32> to vector<1x16x16xf32>
    %132 = vector.shape_cast %129 : vector<1x16x16xf32> to vector<1x1x16x16xf32>
    tpu.vector_store %arg4[%c0_53, %c3_54, %c0_55, %c0_56], %132 {strides = array<i32>} : memref<1x8x16x16xf32, #tpu.memory_space<vmem>>, vector<1x1x16x16xf32>,
    %c4 = arith.constant 4 : index
    %c0_57 = arith.constant 0 : index
    %133 = memref.load %arg2[%c4, %c0_57] : memref<8x4xf32, #tpu.memory_space<smem>>
    %134 = vector.extract_strided_slice %8 {offsets = [0, 0, 0, 0], sizes = [1, 1, 16, 16], strides = [1, 1, 1, 1]} : vector<1x4x16x16xf32> to vector<1x1x16x16xf32>
    %135 = vector.shape_cast %134 : vector<1x1x16x16xf32> to vector<1x16x16xf32>
    %136 = vector.broadcast %133 : f32 to vector<1x16x16xf32>
    %137 = arith.mulf %136, %135 : vector<1x16x16xf32>
    %c4_58 = arith.constant 4 : index
    %c1_59 = arith.constant 1 : index
    %138 = memref.load %arg2[%c4_58, %c1_59] : memref<8x4xf32, #tpu.memory_space<smem>>
    %139 = vector.extract_strided_slice %8 {offsets = [0, 1, 0, 0], sizes = [1, 1, 16, 16], strides = [1, 1, 1, 1]} : vector<1x4x16x16xf32> to vector<1x1x16x16xf32>
    %140 = vector.shape_cast %139 : vector<1x1x16x16xf32> to vector<1x16x16xf32>
    %141 = vector.broadcast %138 : f32 to vector<1x16x16xf32>
    %142 = arith.mulf %141, %140 : vector<1x16x16xf32>
    %143 = arith.addf %137, %142 : vector<1x16x16xf32>
    %c4_60 = arith.constant 4 : index
    %c2_61 = arith.constant 2 : index
    %144 = memref.load %arg2[%c4_60, %c2_61] : memref<8x4xf32, #tpu.memory_space<smem>>
    %145 = vector.extract_strided_slice %8 {offsets = [0, 2, 0, 0], sizes = [1, 1, 16, 16], strides = [1, 1, 1, 1]} : vector<1x4x16x16xf32> to vector<1x1x16x16xf32>
    %146 = vector.shape_cast %145 : vector<1x1x16x16xf32> to vector<1x16x16xf32>
    %147 = vector.broadcast %144 : f32 to vector<1x16x16xf32>
    %148 = arith.mulf %147, %146 : vector<1x16x16xf32>
    %149 = arith.addf %143, %148 : vector<1x16x16xf32>
    %c4_62 = arith.constant 4 : index
    %c3_63 = arith.constant 3 : index
    %150 = memref.load %arg2[%c4_62, %c3_63] : memref<8x4xf32, #tpu.memory_space<smem>>
    %151 = vector.extract_strided_slice %8 {offsets = [0, 3, 0, 0], sizes = [1, 1, 16, 16], strides = [1, 1, 1, 1]} : vector<1x4x16x16xf32> to vector<1x1x16x16xf32>
    %152 = vector.shape_cast %151 : vector<1x1x16x16xf32> to vector<1x16x16xf32>
    %153 = vector.broadcast %150 : f32 to vector<1x16x16xf32>
    %154 = arith.mulf %153, %152 : vector<1x16x16xf32>
    %155 = arith.addf %149, %154 : vector<1x16x16xf32>
    %c4_64 = arith.constant 4 : index
    %156 = memref.load %arg3[%c4_64] : memref<8xf32, #tpu.memory_space<smem>>
    %157 = vector.broadcast %156 : f32 to vector<1x16x16xf32>
    %158 = arith.addf %155, %157 : vector<1x16x16xf32>
    %cst_65 = arith.constant 0.000000e+00 : f32
    %159 = vector.broadcast %cst_65 : f32 to vector<1x16x16xf32>
    %160 = arith.maximumf %158, %159 : vector<1x16x16xf32>
    %c0_66 = arith.constant 0 : index
    %c4_67 = arith.constant 4 : index
    %c0_68 = arith.constant 0 : index
    %c0_69 = arith.constant 0 : index
    %161 = vector.load %arg4[%c0_66, %c4_67, %c0_68, %c0_69] : memref<1x8x16x16xf32, #tpu.memory_space<vmem>>, vector<1x1x16x16xf32>
    %162 = vector.shape_cast %161 : vector<1x1x16x16xf32> to vector<1x16x16xf32>
    %163 = vector.shape_cast %160 : vector<1x16x16xf32> to vector<1x1x16x16xf32>
    tpu.vector_store %arg4[%c0_66, %c4_67, %c0_68, %c0_69], %163 {strides = array<i32>} : memref<1x8x16x16xf32, #tpu.memory_space<vmem>>, vector<1x1x16x16xf32>,
    %c5 = arith.constant 5 : index
    %c0_70 = arith.constant 0 : index
    %164 = memref.load %arg2[%c5, %c0_70] : memref<8x4xf32, #tpu.memory_space<smem>>
    %165 = vector.extract_strided_slice %8 {offsets = [0, 0, 0, 0], sizes = [1, 1, 16, 16], strides = [1, 1, 1, 1]} : vector<1x4x16x16xf32> to vector<1x1x16x16xf32>
    %166 = vector.shape_cast %165 : vector<1x1x16x16xf32> to vector<1x16x16xf32>
    %167 = vector.broadcast %164 : f32 to vector<1x16x16xf32>
    %168 = arith.mulf %167, %166 : vector<1x16x16xf32>
    %c5_71 = arith.constant 5 : index
    %c1_72 = arith.constant 1 : index
    %169 = memref.load %arg2[%c5_71, %c1_72] : memref<8x4xf32, #tpu.memory_space<smem>>
    %170 = vector.extract_strided_slice %8 {offsets = [0, 1, 0, 0], sizes = [1, 1, 16, 16], strides = [1, 1, 1, 1]} : vector<1x4x16x16xf32> to vector<1x1x16x16xf32>
    %171 = vector.shape_cast %170 : vector<1x1x16x16xf32> to vector<1x16x16xf32>
    %172 = vector.broadcast %169 : f32 to vector<1x16x16xf32>
    %173 = arith.mulf %172, %171 : vector<1x16x16xf32>
    %174 = arith.addf %168, %173 : vector<1x16x16xf32>
    %c5_73 = arith.constant 5 : index
    %c2_74 = arith.constant 2 : index
    %175 = memref.load %arg2[%c5_73, %c2_74] : memref<8x4xf32, #tpu.memory_space<smem>>
    %176 = vector.extract_strided_slice %8 {offsets = [0, 2, 0, 0], sizes = [1, 1, 16, 16], strides = [1, 1, 1, 1]} : vector<1x4x16x16xf32> to vector<1x1x16x16xf32>
    %177 = vector.shape_cast %176 : vector<1x1x16x16xf32> to vector<1x16x16xf32>
    %178 = vector.broadcast %175 : f32 to vector<1x16x16xf32>
    %179 = arith.mulf %178, %177 : vector<1x16x16xf32>
    %180 = arith.addf %174, %179 : vector<1x16x16xf32>
    %c5_75 = arith.constant 5 : index
    %c3_76 = arith.constant 3 : index
    %181 = memref.load %arg2[%c5_75, %c3_76] : memref<8x4xf32, #tpu.memory_space<smem>>
    %182 = vector.extract_strided_slice %8 {offsets = [0, 3, 0, 0], sizes = [1, 1, 16, 16], strides = [1, 1, 1, 1]} : vector<1x4x16x16xf32> to vector<1x1x16x16xf32>
    %183 = vector.shape_cast %182 : vector<1x1x16x16xf32> to vector<1x16x16xf32>
    %184 = vector.broadcast %181 : f32 to vector<1x16x16xf32>
    %185 = arith.mulf %184, %183 : vector<1x16x16xf32>
    %186 = arith.addf %180, %185 : vector<1x16x16xf32>
    %c5_77 = arith.constant 5 : index
    %187 = memref.load %arg3[%c5_77] : memref<8xf32, #tpu.memory_space<smem>>
    %188 = vector.broadcast %187 : f32 to vector<1x16x16xf32>
    %189 = arith.addf %186, %188 : vector<1x16x16xf32>
    %cst_78 = arith.constant 0.000000e+00 : f32
    %190 = vector.broadcast %cst_78 : f32 to vector<1x16x16xf32>
    %191 = arith.maximumf %189, %190 : vector<1x16x16xf32>
    %c0_79 = arith.constant 0 : index
    %c5_80 = arith.constant 5 : index
    %c0_81 = arith.constant 0 : index
    %c0_82 = arith.constant 0 : index
    %192 = vector.load %arg4[%c0_79, %c5_80, %c0_81, %c0_82] : memref<1x8x16x16xf32, #tpu.memory_space<vmem>>, vector<1x1x16x16xf32>
    %193 = vector.shape_cast %192 : vector<1x1x16x16xf32> to vector<1x16x16xf32>
    %194 = vector.shape_cast %191 : vector<1x16x16xf32> to vector<1x1x16x16xf32>
    tpu.vector_store %arg4[%c0_79, %c5_80, %c0_81, %c0_82], %194 {strides = array<i32>} : memref<1x8x16x16xf32, #tpu.memory_space<vmem>>, vector<1x1x16x16xf32>,
    %c6 = arith.constant 6 : index
    %c0_83 = arith.constant 0 : index
    %195 = memref.load %arg2[%c6, %c0_83] : memref<8x4xf32, #tpu.memory_space<smem>>
    %196 = vector.extract_strided_slice %8 {offsets = [0, 0, 0, 0], sizes = [1, 1, 16, 16], strides = [1, 1, 1, 1]} : vector<1x4x16x16xf32> to vector<1x1x16x16xf32>
    %197 = vector.shape_cast %196 : vector<1x1x16x16xf32> to vector<1x16x16xf32>
    %198 = vector.broadcast %195 : f32 to vector<1x16x16xf32>
    %199 = arith.mulf %198, %197 : vector<1x16x16xf32>
    %c6_84 = arith.constant 6 : index
    %c1_85 = arith.constant 1 : index
    %200 = memref.load %arg2[%c6_84, %c1_85] : memref<8x4xf32, #tpu.memory_space<smem>>
    %201 = vector.extract_strided_slice %8 {offsets = [0, 1, 0, 0], sizes = [1, 1, 16, 16], strides = [1, 1, 1, 1]} : vector<1x4x16x16xf32> to vector<1x1x16x16xf32>
    %202 = vector.shape_cast %201 : vector<1x1x16x16xf32> to vector<1x16x16xf32>
    %203 = vector.broadcast %200 : f32 to vector<1x16x16xf32>
    %204 = arith.mulf %203, %202 : vector<1x16x16xf32>
    %205 = arith.addf %199, %204 : vector<1x16x16xf32>
    %c6_86 = arith.constant 6 : index
    %c2_87 = arith.constant 2 : index
    %206 = memref.load %arg2[%c6_86, %c2_87] : memref<8x4xf32, #tpu.memory_space<smem>>
    %207 = vector.extract_strided_slice %8 {offsets = [0, 2, 0, 0], sizes = [1, 1, 16, 16], strides = [1, 1, 1, 1]} : vector<1x4x16x16xf32> to vector<1x1x16x16xf32>
    %208 = vector.shape_cast %207 : vector<1x1x16x16xf32> to vector<1x16x16xf32>
    %209 = vector.broadcast %206 : f32 to vector<1x16x16xf32>
    %210 = arith.mulf %209, %208 : vector<1x16x16xf32>
    %211 = arith.addf %205, %210 : vector<1x16x16xf32>
    %c6_88 = arith.constant 6 : index
    %c3_89 = arith.constant 3 : index
    %212 = memref.load %arg2[%c6_88, %c3_89] : memref<8x4xf32, #tpu.memory_space<smem>>
    %213 = vector.extract_strided_slice %8 {offsets = [0, 3, 0, 0], sizes = [1, 1, 16, 16], strides = [1, 1, 1, 1]} : vector<1x4x16x16xf32> to vector<1x1x16x16xf32>
    %214 = vector.shape_cast %213 : vector<1x1x16x16xf32> to vector<1x16x16xf32>
    %215 = vector.broadcast %212 : f32 to vector<1x16x16xf32>
    %216 = arith.mulf %215, %214 : vector<1x16x16xf32>
    %217 = arith.addf %211, %216 : vector<1x16x16xf32>
    %c6_90 = arith.constant 6 : index
    %218 = memref.load %arg3[%c6_90] : memref<8xf32, #tpu.memory_space<smem>>
    %219 = vector.broadcast %218 : f32 to vector<1x16x16xf32>
    %220 = arith.addf %217, %219 : vector<1x16x16xf32>
    %cst_91 = arith.constant 0.000000e+00 : f32
    %221 = vector.broadcast %cst_91 : f32 to vector<1x16x16xf32>
    %222 = arith.maximumf %220, %221 : vector<1x16x16xf32>
    %c0_92 = arith.constant 0 : index
    %c6_93 = arith.constant 6 : index
    %c0_94 = arith.constant 0 : index
    %c0_95 = arith.constant 0 : index
    %223 = vector.load %arg4[%c0_92, %c6_93, %c0_94, %c0_95] : memref<1x8x16x16xf32, #tpu.memory_space<vmem>>, vector<1x1x16x16xf32>
    %224 = vector.shape_cast %223 : vector<1x1x16x16xf32> to vector<1x16x16xf32>
    %225 = vector.shape_cast %222 : vector<1x16x16xf32> to vector<1x1x16x16xf32>
    tpu.vector_store %arg4[%c0_92, %c6_93, %c0_94, %c0_95], %225 {strides = array<i32>} : memref<1x8x16x16xf32, #tpu.memory_space<vmem>>, vector<1x1x16x16xf32>,
    %c7 = arith.constant 7 : index
    %c0_96 = arith.constant 0 : index
    %226 = memref.load %arg2[%c7, %c0_96] : memref<8x4xf32, #tpu.memory_space<smem>>
    %227 = vector.extract_strided_slice %8 {offsets = [0, 0, 0, 0], sizes = [1, 1, 16, 16], strides = [1, 1, 1, 1]} : vector<1x4x16x16xf32> to vector<1x1x16x16xf32>
    %228 = vector.shape_cast %227 : vector<1x1x16x16xf32> to vector<1x16x16xf32>
    %229 = vector.broadcast %226 : f32 to vector<1x16x16xf32>
    %230 = arith.mulf %229, %228 : vector<1x16x16xf32>
    %c7_97 = arith.constant 7 : index
    %c1_98 = arith.constant 1 : index
    %231 = memref.load %arg2[%c7_97, %c1_98] : memref<8x4xf32, #tpu.memory_space<smem>>
    %232 = vector.extract_strided_slice %8 {offsets = [0, 1, 0, 0], sizes = [1, 1, 16, 16], strides = [1, 1, 1, 1]} : vector<1x4x16x16xf32> to vector<1x1x16x16xf32>
    %233 = vector.shape_cast %232 : vector<1x1x16x16xf32> to vector<1x16x16xf32>
    %234 = vector.broadcast %231 : f32 to vector<1x16x16xf32>
    %235 = arith.mulf %234, %233 : vector<1x16x16xf32>
    %236 = arith.addf %230, %235 : vector<1x16x16xf32>
    %c7_99 = arith.constant 7 : index
    %c2_100 = arith.constant 2 : index
    %237 = memref.load %arg2[%c7_99, %c2_100] : memref<8x4xf32, #tpu.memory_space<smem>>
    %238 = vector.extract_strided_slice %8 {offsets = [0, 2, 0, 0], sizes = [1, 1, 16, 16], strides = [1, 1, 1, 1]} : vector<1x4x16x16xf32> to vector<1x1x16x16xf32>
    %239 = vector.shape_cast %238 : vector<1x1x16x16xf32> to vector<1x16x16xf32>
    %240 = vector.broadcast %237 : f32 to vector<1x16x16xf32>
    %241 = arith.mulf %240, %239 : vector<1x16x16xf32>
    %242 = arith.addf %236, %241 : vector<1x16x16xf32>
    %c7_101 = arith.constant 7 : index
    %c3_102 = arith.constant 3 : index
    %243 = memref.load %arg2[%c7_101, %c3_102] : memref<8x4xf32, #tpu.memory_space<smem>>
    %244 = vector.extract_strided_slice %8 {offsets = [0, 3, 0, 0], sizes = [1, 1, 16, 16], strides = [1, 1, 1, 1]} : vector<1x4x16x16xf32> to vector<1x1x16x16xf32>
    %245 = vector.shape_cast %244 : vector<1x1x16x16xf32> to vector<1x16x16xf32>
    %246 = vector.broadcast %243 : f32 to vector<1x16x16xf32>
    %247 = arith.mulf %246, %245 : vector<1x16x16xf32>
    %248 = arith.addf %242, %247 : vector<1x16x16xf32>
    %c7_103 = arith.constant 7 : index
    %249 = memref.load %arg3[%c7_103] : memref<8xf32, #tpu.memory_space<smem>>
    %250 = vector.broadcast %249 : f32 to vector<1x16x16xf32>
    %251 = arith.addf %248, %250 : vector<1x16x16xf32>
    %cst_104 = arith.constant 0.000000e+00 : f32
    %252 = vector.broadcast %cst_104 : f32 to vector<1x16x16xf32>
    %253 = arith.maximumf %251, %252 : vector<1x16x16xf32>
    %c0_105 = arith.constant 0 : index
    %c7_106 = arith.constant 7 : index
    %c0_107 = arith.constant 0 : index
    %c0_108 = arith.constant 0 : index
    %254 = vector.load %arg4[%c0_105, %c7_106, %c0_107, %c0_108] : memref<1x8x16x16xf32, #tpu.memory_space<vmem>>, vector<1x1x16x16xf32>
    %255 = vector.shape_cast %254 : vector<1x1x16x16xf32> to vector<1x16x16xf32>
    %256 = vector.shape_cast %253 : vector<1x16x16xf32> to vector<1x1x16x16xf32>
    tpu.vector_store %arg4[%c0_105, %c7_106, %c0_107, %c0_108], %256 {strides = array<i32>} : memref<1x8x16x16xf32, #tpu.memory_space<vmem>>, vector<1x1x16x16xf32>,
    return
  }
  func.func @transform_0(%arg0: i32) -> (i32, i32, i32, i32) {
    %c0_i32 = arith.constant 0 : i32
    %c0_i32_0 = arith.constant 0 : i32
    %c0_i32_1 = arith.constant 0 : i32
    %c0_i32_2 = arith.constant 0 : i32
    return %arg0, %c0_i32, %c0_i32_0, %c0_i32_1 : i32, i32, i32, i32
  }
  func.func @transform_1(%arg0: i32) -> (i32, i32) {
    %c0_i32 = arith.constant 0 : i32
    %c0_i32_0 = arith.constant 0 : i32
    %c0_i32_1 = arith.constant 0 : i32
    return %c0_i32, %c0_i32_0 : i32, i32
  }
  func.func @transform_2(%arg0: i32) -> i32 {
    %c0_i32 = arith.constant 0 : i32
    %c0_i32_0 = arith.constant 0 : i32
    return %c0_i32 : i32
  }
  func.func @transform_3(%arg0: i32) -> (i32, i32, i32, i32) {
    %c0_i32 = arith.constant 0 : i32
    %c0_i32_0 = arith.constant 0 : i32
    %c0_i32_1 = arith.constant 0 : i32
    %c0_i32_2 = arith.constant 0 : i32
    return %arg0, %c0_i32, %c0_i32_0, %c0_i32_1 : i32, i32, i32, i32
  }
}

</mosaic_0001>

<bundles_post_ra>
// kernel: _lambda_.1
= control target key start
LH: loop header
LB: loop body
LE: loop exit
PB: predicated region body
PF: predicated region fallthrough
CT: control target
= control target key end

     0   :  { %s1652_s0 = inlined_call_operand.hbm [shape: f32[2,4,16,16], index: 0, kind: input, shape index: {}]   ;;  %s1653_s1 = inlined_call_operand.vmem [shape: f32[8,4], index: 1, kind: input, shape index: {}]   ;;  %s1654_s2 = inlined_call_operand.vmem [shape: f32[8], index: 2, kind: input, shape index: {}]   ;;  %s1655_s3 = inlined_call_operand.vmem [shape: f32[2,8,16,16], index: 3, kind: output, shape index: {}]  }
   0x1   :  { %1670 = sst [smem:[#allocation20_spill]] %s1652_s0 }
   0x2   :  { %1671 = sst [smem:[#allocation21_spill]] %s1653_s1 }
   0x3   :  { %1672 = sst [smem:[#allocation22_spill]] %s1654_s2 }
   0x4   :  { %1673 = sst [smem:[#allocation23_spill]] %s1655_s3 }
   0x5   :  { %8 = vsyncpa [#allocation3], 0 }
   0x6   :  { %10 = vsyncpa [#allocation3 + $0x1], 0 }
   0x7   :  { %11 = vsyncpa [#allocation4], 0 }
   0x8   :  { %12 = vsyncpa [#allocation7], 0  ;;  %s1004_s12 = smov 0   ;;  %s1006_s13 = smov 0  }
   0x9   :  { %s1008_s14 = smov 0   ;;  %s1010_s15 = smov 0  }
   0xa LB: > { %1674 = sst [smem:[#allocation11_spill]] %s967_s13  ;;  %s1023_s16 = sadd.s32 4294967295, %s975_s15   ;;  %s975_s15 = sphi %s1010_s15, %s1728_s15   ;;  %s971_s14 = sphi %s1008_s14, %s1731_s14   ;;  %s967_s13 = sphi %s1006_s13, %s1730_s13   ;;  %s963_s12 = sphi %s1004_s12, %s1729_s12  }
   0xb   : > { %1675 = sst [smem:[#allocation12_spill]] %s971_s14  ;;  %s1026_s17 = sadd.s32 1, %s975_s15  }
   0xc   : > { %1676 = sst [smem:[#allocation13_spill]] %s1023_s16  ;;  %s22_s18 = ssub.s32 %s975_s15, %s1026_s17 }
   0xd   : > { %1677 = sst [smem:[#allocation14_spill]] %s1026_s17  ;;  %s25_s19 = sadd.s32 1, %s971_s14 }
   0xe   : > { %p23_p0 = scmp.eq.s32.totalorder %s22_s18, 0  ;;  %p32_p1 = scmp.ne.s32.totalorder %s971_s14, %s967_s13 }
   0xf   : > { %p33_p2 = scmp.eq.s32.totalorder %s975_s15, 0  ;;  %p38_p3 = scmp.ne.s32.totalorder %s967_s13, %s963_s12 }
  0x10   : > { %s1036_s20 = scalar_select %p23_p0, %s971_s14, %s25_s19  }
  0x11   : > { %p1038_p4 = por %p33_p2, %p32_p1  ;;  %p39_p5 = scmp.eq.s32.totalorder %s1023_s16, 0 }
  0x12   : > { %1678 = sst [smem:[#allocation15_spill]] %s1036_s20  ;;  %p739_p6 = scmp.ge.s32.totalorder %s975_s15, 1 }
  0x13   : > { %p117_p7 = scmp.lt.s32.totalorder %s975_s15, 3  ;;  %p1047_p8 = por %p39_p5, %p38_p3 }
  0x14   : > { %s1682_s1 = sld [smem:[#allocation21_spill]]  ;;  %p831_p11 = scmp.lt.s32.totalorder %s975_s15, 2 }
  0x15   : > { %p1051_p9 = pnand %p739_p6, %p117_p7  ;;  %s1683_s2 = sld [smem:[#allocation22_spill]] }
  0x16   : > { %p1068_p13 = pnand %p831_p11, %p1038_p4  ;;  %s150_s4 = sand.u32 1, %s971_s14  }
  0x17   : > { %p818_p10 = pneg %p1051_p9  ;;  %s977_s5 = smov [#allocation5]  }
  0x18   : > { %s978_s6 = smov [#allocation6]   ;;  %s743_s7 = sshll.u32 %s150_s4, 6 }
  0x19   : > { %p819_p12 = pnand %p818_p10, %p39_p5  ;;  %s806_s8 = sshll.u32 %s975_s15, 6 }
  0x1a   : > { %s129_s26 = sshll.u32 %s1682_s1, 4  ;;  %s1685_s0 = sld [smem:[#allocation20_spill]]  ;;  %s130_s26 = int_to_ptr.vmem [resolvable:$true] %s129_s26 }
  0x1b   : > { %s139_s29 = sshll.u32 %s1683_s2, 4  ;;  %s154_s18 = scalar_lea.vmem [#allocation2], %s743_s7  ;;  %s140_s29 = int_to_ptr.vmem [resolvable:$true] %s139_s29 }
  0x1c   : > { %821 = dma.vmem_to_smem (!%p819_p12), %s130_s26, 128, %s977_s5, [#allocation4]  }
  0x1d   : > { %824 = dma.vmem_to_smem (!%p819_p12), %s140_s29, 16, %s978_s6, [#allocation7]  }
  0x1e   : > { %s162_s19 = sshll.u32 %s154_s18, 4  ;;  %s151_s21 = scalar_lea.sflag [#allocation3], %s150_s4  ;;  %s163_s19 = int_to_ptr.vmem [resolvable:$true] %s162_s19 }
  0x1f   : > { %p907_p1 = pneg %p1068_p13 }
  0x20   : > { %s159_s11 = scalar_lea.hbm %s1685_s0, %s806_s8  ;;  %s910_s27 = scalar_lea.hbm %s1685_s0, 128 }
  0x21   : > { %s160_s12 = sshll.u32 %s159_s11, 4  ;;  %s161_s12 = int_to_ptr.hbm [resolvable:$true] %s160_s12 }
  0x22   : > { %s903_s24 = sshra.s32 %s161_s12, 4  ;;  %s904_s24 = int_to_ptr.hbm [resolvable:$true] %s903_s24 }
  0x23   : > { %s905_s25 = scalar_lea.hbm %s904_s24, 64  ;;  %p911_p4 = scmp.lt.s32.totalorder %s904_s24, %s1685_s0 }
  0x24   : > { %p906_p0 = scmp.ne.s32.totalorder %s904_s24, %s905_s25  ;;  %p912_p6 = scmp.lt.s32.totalorder %s910_s27, %s905_s25 }
  0x26   : > { %p908_p2 = pnand %p907_p1, %p906_p0  ;;  %p913_p7 = por %p912_p6, %p911_p4 }
  0x28   : > { %p909_p3 = pneg %p908_p2 }
  0x2a   : > { %p914_p10 = pnand %p913_p7, %p909_p3 }
  0x2c   : > { %917 = shalt.err (!%p914_p10)
}
  0x2d   : > { %s979_s4 = smov 128   ;;  %s980_s5 = smov 8  }
  0x2e   : > { %828 = dma.hbm_to_vmem [thread:$0]  (!%p1068_p13), %s161_s12, 1024, %s163_s19, %s151_s21, %s979_s4, %s979_s4, %s980_s5  }
  0x2f   : > { %174 = sbr.rel (%p1051_p9) target bundleno = 486 (0x1e6), region = 32 }
  0x34   : > { %s176_s6 = sand.u32 1, %s967_s13  }
  0x35   : > { %s747_s7 = sshll.u32 %s176_s6, 6  ;;  %s177_s8 = scalar_lea.sflag [#allocation3], %s176_s6 }
  0x36   : > { %s180_s9 = scalar_lea.vmem [#allocation2], %s747_s7 }
  0x37   : > { %950 = dma.done.wait (%p1047_p8), %s177_s8, 1024  }
  0x38   : > { %952 = vsyncadd (%p1047_p8), %s177_s8, 4294966272 }
  0x39   : > { %954 = dma.done.wait (%p39_p5), [#allocation4], 128  }
  0x3a   : > { %956 = vsyncadd (%p39_p5), [#allocation4], 4294967168 }
  0x3b   : > { %958 = dma.done.wait (%p39_p5), [#allocation7], 16  }
  0x3c   : > { %960 = vsyncadd (%p39_p5), [#allocation7], 4294967280 }
  0x3d   : > { %196 = sfence }
  0x3e   : > { %v1102_v0 = vld [vmem:[%s180_s9 + $0x10] sm:$0xff]  ;;  %v1104_v1 = vld [vmem:[%s180_s9] sm:$0xff]  ;;  %s981_s23 = smov 16   ;;  %v1114_v3 = vld [vmem:[%s180_s9 + $0x18] sm:$0xff]  ;;  %vm228_vm0 = vcmask 1047680   ;;  %s982_s22 = smov 113   ;;  %v357_v44 = vlaneseq }
  0x3f   : > { %235 = vrot.lane.b32.xlu1 %v1102_v0, %s981_s23  ;;  %229 = vrot.lane.b32.xlu0 %v1104_v1, %s981_s23  ;;  %v1110_v2 = vld [vmem:[%s180_s9 + $0x20] sm:$0xff]  ;;  %v1116_v4 = vld [vmem:[%s180_s9 + $0x8] sm:$0xff]  ;;  %s983_s30 = smov 127   ;;  %s1174_s10 = sld [smem:[#allocation5]]  ;;  %vm429_vm3 = vcmask 130048  }
  0x40   : > { %241 = vrot.lane.b32.xlu2 %v1110_v2, %s981_s23  ;;  %v1118_v5 = vld [vmem:[%s180_s9 + $0x28] sm:$0xff]  ;;  %v1126_v6 = vld [vmem:[%s180_s9 + $0x38] sm:$0xff]  ;;  %v1128_v7 = vld [vmem:[%s180_s9 + $0x30] sm:$0xff]  ;;  %s1176_s11 = sld [smem:[#allocation5 + $0x80]]  ;;  %v1212_v49 = vshrl.u32 %v357_v44, 7 }
  0x41   : > { %s1178_s12 = sld [smem:[#allocation5 + $0x100]] }
  0x42   : > { %s1182_s18 = sld [smem:[#allocation5 + $0x180]]  ;;  %vm359_vm1 = vcmp.lt.s32.totalorder %v1212_v49, 1  ;;  %vm384_vm2 = vcmp.lt.s32.totalorder %v1212_v49, 7 }
  0x43   : > { %s1184_s19 = sld [smem:[#allocation5 + $0x200]] }
  0x44   : > { %s1186_s21 = sld [smem:[#allocation5 + $0x280]] }
  0x45   : > { %s1188_s24 = sld [smem:[#allocation5 + $0x300]]  ;;  %v402_v55 = vstv %s1174_s10 }
  0x46   : > { %s1192_s25 = sld [smem:[#allocation5 + $0x380]]  ;;  %v433_v56 = vstv %s1176_s11 }
  0x47   : > { %238 = vrot.lane.b32.xlu1 %v1114_v3, %s981_s23  ;;  %232 = vrot.lane.b32.xlu0 %v1116_v4, %s981_s23  ;;  %s1194_s26 = sld [smem:[#allocation5 + $0x2]]  ;;  %v464_v60 = vstv %s1178_s12 }
  0x48   : > { %244 = vrot.lane.b32.xlu2 %v1118_v5, %s981_s23  ;;  %s1196_s15 = sld [smem:[#allocation5 + $0x82]]  ;;  %v495_v61 = vstv %s1182_s18 }
  0x49   : > { %s1198_s27 = sld [smem:[#allocation5 + $0x102]]  ;;  %v526_v62 = vstv %s1184_s19 }
  0x4a   : > { %s1200_s28 = sld [smem:[#allocation5 + $0x182]] }
  0x4b   : > { %s1202_s29 = sld [smem:[#allocation5 + $0x202]] }
  0x4c   : > { %s1204_s4 = sld [smem:[#allocation5 + $0x282]] }
  0x4d   : > { %s1210_s5 = sld [smem:[#allocation5 + $0x302]] }
  0x4e   : > { %s1214_s6 = sld [smem:[#allocation5 + $0x382]] }
  0x4f   : > { %250 = vrot.lane.b32.xlu1 %v1126_v6, %s981_s23  ;;  %247 = vrot.lane.b32.xlu0 %v1128_v7, %s981_s23  ;;  %s1216_s7 = sld [smem:[#allocation5 + $0x1]] }
  0x50   : > { %s1218_s8 = sld [smem:[#allocation5 + $0x81]] }
  0x51   : > { %s1220_s9 = sld [smem:[#allocation5 + $0x101]] }
  0x52   : > { %s1233_s0 = sld [smem:[#allocation5 + $0x301]] }
  0x53   : > { %s1242_s1 = sld [smem:[#allocation5 + $0x381]] }
  0x54   : > { %1686 = sst [smem:[#allocation16_spill]] %s1214_s6 }
  0x55   : > { %s1247_s2 = sld [smem:[#allocation5 + $0x3]] }
  0x56   : > { %s1253_s20 = sld [smem:[#allocation6]] }
  0x57   : > { %1687 = sst [smem:[#allocation17_spill]] %s1220_s9 }
  0x58   : > { %s1257_s14 = sld [smem:[#allocation5 + $0x83]] }
  0x59   : > { %1689 = sst [smem:[#allocation19_spill]] %s1242_s1 }
  0x5a   : > { %s1263_s13 = sld [smem:[#allocation6 + $0x1]] }
  0x5b   : > { %s1271_s17 = sld [smem:[#allocation5 + $0x103]] }
  0x5c   : > { %s1279_s3 = sld [smem:[#allocation6 + $0x2]] }
  0x5d   : > { %s1284_s16 = sld [smem:[#allocation5 + $0x183]] }
  0x5e   : > { %s1330_s10 = sld [smem:[#allocation6 + $0x5]] }
  0x5f   : > { %s1344_s11 = sld [smem:[#allocation5 + $0x303]] }
  0x60   : > { %s1362_s12 = sld [smem:[#allocation6 + $0x6]] }
  0x61   : > { %s1370_s18 = sld [smem:[#allocation5 + $0x383]] }
  0x62   : > { %s1378_s19 = sld [smem:[#allocation6 + $0x7]] }
  0x9a   : > { %v242_v8 = vpop.permute.xlu2 %241 }
  0x9b   : > { %v243_v21 = vsel %vm228_vm0, %v242_v8, %v1110_v2  ;;  %v588_v8 = vstv %s1188_s24 }
  0xa2   : > { %v245_v13 = vpop.permute.xlu2 %244 }
  0xa3   : > { %v246_v14 = vsel %vm228_vm0, %v245_v13, %v1118_v5  ;;  %v412_v13 = vstv %s1194_s26 }
  0xb1   : > { %v236_v9 = vpop.permute.xlu1 %235  ;;  %v230_v10 = vpop.permute.xlu0 %229 }
  0xb2   : > { %v237_v11 = vsel %vm228_vm0, %v236_v9, %v1102_v0  ;;  %v231_v12 = vsel %vm228_vm0, %v230_v10, %v1104_v1  ;;  %v619_v9 = vstv %s1192_s25 }
  0xb3   : > { %257 = vrot.lane.b32.xlu1 %v237_v11, %s981_s23  ;;  %253 = vrot.lane.b32.xlu2 %v231_v12, %s981_s23 }
  0xb9   : > { %v239_v15 = vpop.permute.xlu1 %238  ;;  %v233_v16 = vpop.permute.xlu0 %232 }
  0xba   : > { %v240_v17 = vsel %vm228_vm0, %v239_v15, %v1114_v3  ;;  %v234_v18 = vsel %vm228_vm0, %v233_v16, %v1116_v4  ;;  %v443_v16 = vstv %s1196_s15 }
  0xbb   : > { %263 = vrot.lane.b32.xlu1 %v246_v14, %s981_s23  ;;  %259 = vrot.lane.b32.xlu2 %v240_v17, %s981_s23  ;;  %v474_v17 = vstv %s1198_s27 }
  0xbc   : > { %255 = vrot.lane.b32.xlu0 %v234_v18, %s981_s23  ;;  %v505_v18 = vstv %s1200_s28 }
  0xc1   : > { %v248_v19 = vpop.permute.xlu0 %247  ;;  %v251_v22 = vpop.permute.xlu1 %250 }
  0xc2   : > { %v249_v20 = vsel %vm228_vm0, %v248_v19, %v1128_v7  ;;  %v252_v23 = vsel %vm228_vm0, %v251_v22, %v1126_v6  ;;  %v536_v19 = vstv %s1202_s29 }
  0xc3   : > { %265 = vrot.lane.b32.xlu2 %v249_v20, %s981_s23  ;;  %v567_v20 = vstv %s1204_s4 }
  0xc4   : > { %261 = vrot.lane.b32.xlu0 %v243_v21, %s981_s23 }
  0xcc   : > { %267 = vrot.lane.b32.xlu0 %v252_v23, %s981_s23  ;;  %s1223_s23 = sld [smem:[#allocation5 + $0x181]]  ;;  %v629_v23 = vstv %s1214_s6 }
  0xcd   : > { %s1291_s6 = sld [smem:[#allocation6 + $0x3]] }
 0x10d   : > { %v254_v24 = vpop.permute.xlu2 %253 }
 0x10e   : > { %v269_v25 = vsel %vm228_vm0, %v254_v24, %v1104_v1  ;;  %v406_v24 = vstv %s1216_s7 }
 0x10f   : > { %285 = vrot.lane.b32.xlu1 %v269_v25, %s982_s22 }
 0x115   : > { %v260_v26 = vpop.permute.xlu2 %259 }
 0x116   : > { %v272_v27 = vsel %vm228_vm0, %v260_v26, %v1114_v3 }
 0x117   : > { %291 = vrot.lane.b32.xlu1 %v272_v27, %s982_s22 }
 0x11d   : > { %v266_v38 = vpop.permute.xlu2 %265 }
 0x11e   : > { %v275_v39 = vsel %vm228_vm0, %v266_v38, %v1128_v7 }
 0x11f   : > { %317 = vrot.lane.b32.xlu1 %v269_v25, %s983_s30 }
 0x125   : > { %v258_v28 = vpop.permute.xlu1 %257 }
 0x126   : > { %v271_v29 = vsel %vm228_vm0, %v258_v28, %v1102_v0 }
 0x127   : > { %323 = vrot.lane.b32.xlu1 %v272_v27, %s983_s30  ;;  %289 = vrot.lane.b32.xlu0 %v271_v29, %s982_s22 }
 0x12d   : > { %v264_v30 = vpop.permute.xlu1 %263 }
 0x12e   : > { %v256_v31 = vpop.permute.xlu0 %255  ;;  %v274_v32 = vsel %vm228_vm0, %v264_v30, %v1118_v5  ;;  %v437_v30 = vstv %s1218_s8 }
 0x12f   : > { %295 = vrot.lane.b32.xlu0 %v274_v32, %s982_s22  ;;  %v270_v33 = vsel %vm228_vm0, %v256_v31, %v1116_v4  ;;  %v468_v31 = vstv %s1220_s9  ;;  %s1295_s9 = sld [smem:[#allocation5 + $0x203]] }
 0x130   : > { %287 = vrot.lane.b32.xlu2 %v270_v33, %s982_s22 }
 0x136   : > { %v262_v34 = vpop.permute.xlu0 %261 }
 0x137   : > { %321 = vrot.lane.b32.xlu0 %v271_v29, %s983_s30  ;;  %v273_v35 = vsel %vm228_vm0, %v262_v34, %v1110_v2 }
 0x138   : > { %325 = vrot.lane.b32.xlu1 %v273_v35, %s983_s30  ;;  %293 = vrot.lane.b32.xlu2 %v273_v35, %s982_s22  ;;  %v499_v35 = vstv %s1223_s23 }
 0x13e   : > { %v268_v36 = vpop.permute.xlu0 %267 }
 0x13f   : > { %v276_v37 = vsel %vm228_vm0, %v268_v36, %v1126_v6 }
 0x140   : > { %319 = vrot.lane.b32.xlu2 %v270_v33, %s983_s30  ;;  %331 = vrot.lane.b32.xlu1 %v276_v37, %s983_s30 }
 0x141   : > { %299 = vrot.lane.b32.xlu0 %v276_v37, %s982_s22 }
 0x148   : > { %297 = vrot.lane.b32.xlu2 %v275_v39, %s982_s22  ;;  %s1225_s22 = sld [smem:[#allocation5 + $0x201]] }
 0x149   : > { %329 = vrot.lane.b32.xlu0 %v275_v39, %s983_s30  ;;  %v592_v39 = vstv %s1233_s0  ;;  %s1694_s0 = sld [smem:[#allocation13_spill]] }
 0x14e   : > { %v530_v36 = vstv %s1225_s22 }
 0x14f   : > { %p215_p5 = scmp.lt.s32.totalorder %s1694_s0, 1 }
 0x150   : > { %327 = vrot.lane.b32.xlu2 %v274_v32, %s983_s30  ;;  %s1227_s30 = sld [smem:[#allocation5 + $0x281]] }
 0x151   : > { %s1733_s0 = smov (!%p215_p5, %s1694_s0), 1 }
 0x156   : > { %1688 = sst [smem:[#allocation18_spill]] %s1227_s30  ;;  %v561_v37 = vstv %s1227_s30 }
 0x157   : > { %s1305_s30 = sld [smem:[#allocation6 + $0x4]] }
 0x181   : > { %v286_v40 = vpop.permute.xlu1 %285 }
 0x182   : > { %v309_v46 = vmax.f32 %v1104_v1, %v286_v40  ;;  %v623_v40 = vstv %s1242_s1  ;;  %s1312_s1 = sld [smem:[#allocation5 + $0x283]] }
 0x189   : > { %v1180_v42 = vpop.permute.xlu1 %291 }
 0x18a   : > { %v288_v41 = vpop.permute.xlu2 %287  ;;  %v312_v11 = vmax.f32 %v1114_v3, %v1180_v42  ;;  %v598_v3 = vstv %s1210_s5 }
 0x18b   : > { %v310_v47 = vmax.f32 %v1116_v4, %v288_v41  ;;  %v557_v4 = vstv %s1186_s21 }
 0x191   : > { %v318_v45 = vpop.permute.xlu1 %317 }
 0x192   : > { %v1190_v43 = vpop.permute.xlu2 %293  ;;  %v341_v51 = vmax.f32 %v309_v46, %v318_v45 }
 0x193   : > { %v313_v21 = vmax.f32 %v1110_v2, %v1190_v43 }
 0x194   : > { %v349_v54 = vrot.slane %v341_v51, 7  ;;  %v376_v14 = vrot.slane %v341_v51, 1 }
 0x199   : > { %v1208_v48 = vpop.permute.xlu0 %289  ;;  %v324_v59 = vpop.permute.xlu1 %323 }
 0x19a   : > { %v320_v50 = vpop.permute.xlu2 %319  ;;  %v1273_v25 = vmax.f32 %v312_v11, %v324_v59  ;;  %v311_v28 = vmax.f32 %v1102_v0, %v1208_v48 }
 0x19b   : > { %v342_v52 = vmax.f32 %v310_v47, %v320_v50 }
 0x19c   : > { %v354_v41 = vrot.slane %v1273_v25, 7  ;;  %v381_v42 = vrot.slane %v1273_v25, 1 }
 0x19d   : > { %v353_v53 = vrot.slane %v342_v52, 7  ;;  %v380_v10 = vrot.slane %v342_v52, 1 }
 0x19f   : > { %v364_v57 = vsel %vm359_vm1, %v353_v53, %v349_v54  ;;  %v360_v63 = vsel %vm359_vm1, %v349_v54, %v353_v53  ;;  %v385_v22 = vsel %vm384_vm2, %v376_v14, %v380_v10  ;;  %v389_v26 = vsel %vm384_vm2, %v380_v10, %v376_v14 }
 0x1a0   : > { %v368_v12 = vmax.f32 %v341_v51, %v364_v57  ;;  %v369_v15 = vmax.f32 %v342_v52, %v360_v63 }
 0x1a1   : > { %v296_v58 = vpop.permute.xlu0 %295 }
 0x1a2   : > { %v1240_v1 = vpop.permute.xlu2 %297  ;;  %v393_v27 = vmax.f32 %v368_v12, %v385_v22  ;;  %v394_v2 = vmax.f32 %v369_v15, %v389_v26  ;;  %v314_v29 = vmax.f32 %v1118_v5, %v296_v58 }
 0x1a3   : > { %v315_v44 = vmax.f32 %v1128_v7, %v1240_v1 }
 0x1a4   : > { %v1301_v43 = vmul.f32 %v402_v55, %v393_v27  ;;  %v1309_v45 = vmul.f32 %v402_v55, %v394_v2  ;;  %v1316_v50 = vmul.f32 %v433_v56, %v393_v27  ;;  %v1320_v51 = vmul.f32 %v433_v56, %v394_v2 }
 0x1a5   : > { %v1324_v52 = vmul.f32 %v464_v60, %v393_v27  ;;  %v1328_v53 = vmul.f32 %v464_v60, %v394_v2  ;;  %v1334_v54 = vmul.f32 %v495_v61, %v393_v27  ;;  %v1338_v55 = vmul.f32 %v495_v61, %v394_v2 }
 0x1a6   : > { %v1348_v58 = vmul.f32 %v526_v62, %v393_v27  ;;  %v1352_v59 = vmul.f32 %v526_v62, %v394_v2  ;;  %v1356_v60 = vmul.f32 %v557_v4, %v393_v27  ;;  %v1360_v61 = vmul.f32 %v557_v4, %v394_v2 }
 0x1a7   : > { %v1366_v63 = vmul.f32 %v588_v8, %v393_v27  ;;  %v1374_v12 = vmul.f32 %v588_v8, %v394_v2  ;;  %v1386_v22 = vmul.f32 %v619_v9, %v394_v2 }
 0x1a9   : > { %v322_v32 = vpop.permute.xlu0 %321 }
 0x1aa   : > { %v326_v33 = vpop.permute.xlu1 %325  ;;  %v328_v34 = vpop.permute.xlu2 %327  ;;  %v1289_v0 = vmax.f32 %v311_v28, %v322_v32 }
 0x1ab   : > { %v345_v38 = vmax.f32 %v313_v21, %v326_v33  ;;  %v346_v5 = vmax.f32 %v314_v29, %v328_v34  ;;  %v1382_v21 = vmul.f32 %v619_v9, %v393_v27 }
 0x1ac   : > { %v350_v48 = vrot.slane %v1289_v0, 7  ;;  %v377_v8 = vrot.slane %v1289_v0, 1 }
 0x1ad   : > { %v351_v46 = vrot.slane %v345_v38, 7  ;;  %v355_v47 = vrot.slane %v346_v5, 7  ;;  %v378_v10 = vrot.slane %v345_v38, 1  ;;  %v382_v11 = vrot.slane %v346_v5, 1 }
 0x1ae   : > { %v365_v62 = vsel %vm359_vm1, %v354_v41, %v350_v48  ;;  %v361_v15 = vsel %vm359_vm1, %v350_v48, %v354_v41 }
 0x1af   : > { %v362_v57 = vsel %vm359_vm1, %v351_v46, %v355_v47  ;;  %v366_v56 = vsel %vm359_vm1, %v355_v47, %v351_v46  ;;  %v370_v28 = vmax.f32 %v1289_v0, %v365_v62  ;;  %v387_v34 = vsel %vm384_vm2, %v378_v10, %v382_v11 }
 0x1b0   : > { %v372_v4 = vmax.f32 %v345_v38, %v366_v56  ;;  %v373_v14 = vmax.f32 %v346_v5, %v362_v57  ;;  %v391_v9 = vsel %vm384_vm2, %v382_v11, %v378_v10  ;;  %v371_v27 = vmax.f32 %v1273_v25, %v361_v15 }
 0x1b1   : > { %v386_v46 = vsel %vm384_vm2, %v377_v8, %v381_v42  ;;  %v390_v57 = vsel %vm384_vm2, %v381_v42, %v377_v8 }
 0x1b2   : > { %v397_v38 = vmax.f32 %v372_v4, %v387_v34  ;;  %v398_v5 = vmax.f32 %v373_v14, %v391_v9  ;;  %v395_v56 = vmax.f32 %v370_v28, %v386_v46  ;;  %v396_v4 = vmax.f32 %v371_v27, %v390_v57 }
 0x1b3   : > { %v300_v10 = vpop.permute.xlu0 %299 }
 0x1b4   : > { %v413_v9 = vmul.f32 %v412_v13, %v397_v38  ;;  %v414_v42 = vmul.f32 %v412_v13, %v398_v5  ;;  %v444_v8 = vmul.f32 %v443_v16, %v397_v38  ;;  %v445_v27 = vmul.f32 %v443_v16, %v398_v5 }
 0x1b5   : > { %v475_v46 = vmul.f32 %v474_v17, %v397_v38  ;;  %v476_v57 = vmul.f32 %v474_v17, %v398_v5  ;;  %v506_v15 = vmul.f32 %v505_v18, %v397_v38  ;;  %v507_v13 = vmul.f32 %v505_v18, %v398_v5 }
 0x1b6   : > { %v1433_v62 = vmul.f32 %v536_v19, %v397_v38  ;;  %v1437_v28 = vmul.f32 %v536_v19, %v398_v5  ;;  %v407_v16 = vmul.f32 %v406_v24, %v395_v56  ;;  %v1443_v25 = vmul.f32 %v567_v20, %v397_v38 }
 0x1b7   : > { %v1447_v17 = vmul.f32 %v567_v20, %v398_v5  ;;  %v1451_v34 = vmul.f32 %v598_v3, %v397_v38  ;;  %v408_v18 = vmul.f32 %v406_v24, %v396_v4  ;;  %v1457_v19 = vmul.f32 %v598_v3, %v398_v5 }
 0x1b8   : > { %v1461_v14 = vmul.f32 %v629_v23, %v397_v38  ;;  %v1465_v11 = vmul.f32 %v629_v23, %v398_v5  ;;  %v438_v20 = vmul.f32 %v437_v30, %v395_v56  ;;  %v439_v48 = vmul.f32 %v437_v30, %v396_v4 }
 0x1b9   : > { %v469_v24 = vmul.f32 %v468_v31, %v395_v56  ;;  %v470_v47 = vmul.f32 %v468_v31, %v396_v4  ;;  %v500_v3 = vmul.f32 %v499_v35, %v395_v56  ;;  %v409_v0 = vadd.f32 %v407_v16, %v1301_v43  ;;  %v332_v16 = vpop.permute.xlu1 %331 }
 0x1ba   : > { %v501_v38 = vmul.f32 %v499_v35, %v396_v4  ;;  %v531_v33 = vmul.f32 %v530_v36, %v395_v56  ;;  %v316_v23 = vmax.f32 %v1126_v6, %v300_v10  ;;  %v410_v5 = vadd.f32 %v408_v18, %v1309_v45 }
 0x1bb   : > { %v532_v29 = vmul.f32 %v530_v36, %v396_v4  ;;  %v562_v30 = vmul.f32 %v561_v37, %v395_v56  ;;  %v563_v41 = vmul.f32 %v561_v37, %v396_v4  ;;  %v593_v31 = vmul.f32 %v592_v39, %v395_v56  ;;  %v330_v32 = vpop.permute.xlu0 %329 }
 0x1bc   : > { %v594_v2 = vmul.f32 %v592_v39, %v396_v4  ;;  %v624_v43 = vmul.f32 %v623_v40, %v395_v56  ;;  %v625_v35 = vmul.f32 %v623_v40, %v396_v4  ;;  %v440_v6 = vadd.f32 %v438_v20, %v1316_v50 }
 0x1bd   : > { %v441_v45 = vadd.f32 %v439_v48, %v1320_v51  ;;  %v471_v36 = vadd.f32 %v469_v24, %v1324_v52  ;;  %v348_v10 = vmax.f32 %v316_v23, %v332_v16  ;;  %v472_v18 = vadd.f32 %v470_v47, %v1328_v53 }
 0x1be   : > { %v502_v37 = vadd.f32 %v500_v3, %v1334_v54  ;;  %v503_v26 = vadd.f32 %v501_v38, %v1338_v55  ;;  %v533_v39 = vadd.f32 %v531_v33, %v1348_v58  ;;  %v534_v56 = vadd.f32 %v532_v29, %v1352_v59 }
 0x1bf   : > { %v564_v40 = vadd.f32 %v562_v30, %v1356_v60  ;;  %v565_v50 = vadd.f32 %v563_v41, %v1360_v61  ;;  %v347_v51 = vmax.f32 %v315_v44, %v330_v32  ;;  %v595_v52 = vadd.f32 %v593_v31, %v1366_v63 }
 0x1c0   : > { %v596_v53 = vadd.f32 %v594_v2, %v1374_v12  ;;  %v626_v54 = vadd.f32 %v624_v43, %v1382_v21  ;;  %v627_v55 = vadd.f32 %v625_v35, %v1386_v22  ;;  %v356_v58 = vrot.slane %v348_v10, 7 }
 0x1c1   : > { %v415_v33 = vadd.f32 %v413_v9, %v409_v0  ;;  %v352_v59 = vrot.slane %v347_v51, 7  ;;  %v379_v29 = vrot.slane %v347_v51, 1  ;;  %v416_v47 = vadd.f32 %v414_v42, %v410_v5 }
 0x1c2   : > { %v446_v60 = vadd.f32 %v444_v8, %v440_v6  ;;  %v447_v48 = vadd.f32 %v445_v27, %v441_v45  ;;  %v477_v61 = vadd.f32 %v475_v46, %v471_v36  ;;  %v383_v7 = vrot.slane %v348_v10, 1 }
 0x1c3   : > { %v478_v1 = vadd.f32 %v476_v57, %v472_v18  ;;  %v363_v44 = vsel %vm359_vm1, %v352_v59, %v356_v58  ;;  %v367_v63 = vsel %vm359_vm1, %v356_v58, %v352_v59  ;;  %v508_v12 = vadd.f32 %v506_v15, %v502_v37 }
 0x1c4   : > { %v509_v21 = vadd.f32 %v507_v13, %v503_v26  ;;  %v374_v22 = vmax.f32 %v347_v51, %v367_v63  ;;  %v375_v32 = vmax.f32 %v348_v10, %v363_v44  ;;  %v539_v2 = vadd.f32 %v1433_v62, %v533_v39 }
 0x1c5   : > { %v540_v0 = vadd.f32 %v1437_v28, %v534_v56  ;;  %v388_v41 = vsel %vm384_vm2, %v379_v29, %v383_v7  ;;  %v392_v4 = vsel %vm384_vm2, %v383_v7, %v379_v29  ;;  %v570_v26 = vadd.f32 %v1443_v25, %v564_v40 }
 0x1c6   : > { %v571_v15 = vadd.f32 %v1447_v17, %v565_v50  ;;  %v399_v62 = vmax.f32 %v374_v22, %v388_v41  ;;  %v400_v9 = vmax.f32 %v375_v32, %v392_v4  ;;  %v601_v42 = vadd.f32 %v1451_v34, %v595_v52 }
 0x1c7   : > { %v602_v8 = vadd.f32 %v1457_v19, %v596_v53  ;;  %v632_v49 = vadd.f32 %v1461_v14, %v626_v54  ;;  %v633_v28 = vadd.f32 %v1465_v11, %v627_v55  ;;  %v1695_v27 = vstv %s1247_s2  ;;  %s807_s2 = sshll.u32 %s1733_s0, 7 }
 0x1c8   : > { %v419_v46 = vmul.f32 %v1695_v27, %v399_v62  ;;  %v1696_v25 = vmov %v1695_v27  ;;  %v1697_v13 = vstv %s1257_s14  ;;  %v1699_v3 = vstv %s1271_s17  ;;  %s1707_s17 = sld [smem:[#allocation23_spill]] }
 0x1c9   : > { %v420_v57 = vmul.f32 %v1696_v25, %v400_v9  ;;  %v450_v17 = vmul.f32 %v1697_v13, %v399_v62  ;;  %v1698_v20 = vmov %v1697_v13  ;;  %v481_v38 = vmul.f32 %v1699_v3, %v399_v62 }
 0x1ca   : > { %v451_v24 = vmul.f32 %v1698_v20, %v400_v9  ;;  %v1700_v34 = vmov %v1699_v3  ;;  %v1701_v23 = vstv %s1284_s16  ;;  %v421_v30 = vadd.f32 %v419_v46, %v415_v33 }
 0x1cb   : > { %v482_v19 = vmul.f32 %v1700_v34, %v400_v9  ;;  %v512_v14 = vmul.f32 %v1701_v23, %v399_v62  ;;  %v1702_v5 = vmov %v1701_v23  ;;  %v422_v31 = vadd.f32 %v420_v57, %v416_v47 }
 0x1cc   : > { %v513_v11 = vmul.f32 %v1702_v5, %v400_v9  ;;  %v452_v43 = vadd.f32 %v450_v17, %v446_v60  ;;  %v453_v35 = vadd.f32 %v451_v24, %v447_v48  ;;  %v483_v16 = vadd.f32 %v481_v38, %v477_v61 }
 0x1cd   : > { %v484_v6 = vadd.f32 %v482_v19, %v478_v1  ;;  %v514_v45 = vadd.f32 %v512_v14, %v508_v12  ;;  %v1703_v10 = vstv %s1253_s20  ;;  %v1705_v56 = vstv %s1263_s13 }
 0x1ce   : > { %v515_v36 = vadd.f32 %v513_v11, %v509_v21  ;;  %v425_v18 = vadd.f32 %v1703_v10, %v421_v30  ;;  %v1704_v37 = vmov %v1703_v10  ;;  %v456_v40 = vadd.f32 %v1705_v56, %v452_v43  ;;  %s1565_s15 = scalar_lea.vmem %s1707_s17, %s807_s2 }
 0x1cf   : > { %v426_v39 = vadd.f32 %v1704_v37, %v422_v31  ;;  %v1706_v50 = vmov %v1705_v56  ;;  %v1708_v52 = vstv %s1279_s3  ;;  %v1710_v58 = vstv %s1291_s6 }
 0x1d0   : > { %v457_v51 = vadd.f32 %v1706_v50, %v453_v35  ;;  %v487_v53 = vadd.f32 %v1708_v52, %v483_v16  ;;  %v1709_v54 = vmov %v1708_v52  ;;  %v518_v33 = vadd.f32 %v1710_v58, %v514_v45 }
 0x1d1   : > { %v488_v55 = vadd.f32 %v1709_v54, %v484_v6  ;;  %v1711_v59 = vmov %v1710_v58  ;;  %v427_v47 = vmax.f32 %v425_v18, 0.0  ;;  %v428_v60 = vmax.f32 %v426_v39, 0.0 }
 0x1d2   : > { %v519_v29 = vadd.f32 %v1711_v59, %v515_v36  ;;  %v458_v48 = vmax.f32 %v456_v40, 0.0  ;;  %v459_v61 = vmax.f32 %v457_v51, 0.0  ;;  %v489_v7 = vmax.f32 %v487_v53, 0.0 }
 0x1d3   : > { %v490_v1 = vmax.f32 %v488_v55, 0.0  ;;  %v520_v44 = vmax.f32 %v518_v33, 0.0  ;;  %430 = vst.msk [vmem:[%s1565_s15] sm:$0xff] %vm429_vm3, %v427_v47  ;;  %v1712_v12 = vstv %s1295_s9  ;;  %v1714_v41 = vstv %s1312_s1 }
 0x1d4   : > { %v521_v63 = vmax.f32 %v519_v29, 0.0  ;;  %v543_v21 = vmul.f32 %v1712_v12, %v399_v62  ;;  %v1713_v22 = vmov %v1712_v12  ;;  %v574_v4 = vmul.f32 %v1714_v41, %v399_v62  ;;  %431 = vst.msk [vmem:[%s1565_s15 + $0x8] sm:$0xff] %vm429_vm3, %v428_v60 }
 0x1d5   : > { %v544_v32 = vmul.f32 %v1713_v22, %v400_v9  ;;  %v1715_v27 = vmov %v1714_v41  ;;  %v1716_v25 = vstv %s1344_s11  ;;  %v1718_v20 = vstv %s1370_s18  ;;  %760 = vst.msk [vmem:[%s1565_s15 + $0x10] sm:$0xff] %vm429_vm3, %v458_v48 }
 0x1d6   : > { %v575_v46 = vmul.f32 %v1715_v27, %v400_v9  ;;  %v605_v57 = vmul.f32 %v1716_v25, %v399_v62  ;;  %v1717_v13 = vmov %v1716_v25  ;;  %v636_v24 = vmul.f32 %v1718_v20, %v399_v62  ;;  %761 = vst.msk [vmem:[%s1565_s15 + $0x18] sm:$0xff] %vm429_vm3, %v459_v61 }
 0x1d7   : > { %v606_v17 = vmul.f32 %v1717_v13, %v400_v9  ;;  %v1719_v3 = vmov %v1718_v20  ;;  %v545_v34 = vadd.f32 %v543_v21, %v539_v2  ;;  %v546_v19 = vadd.f32 %v544_v32, %v540_v0  ;;  %767 = vst.msk [vmem:[%s1565_s15 + $0x20] sm:$0xff] %vm429_vm3, %v489_v7 }
 0x1d8   : > { %v637_v38 = vmul.f32 %v1719_v3, %v400_v9  ;;  %v576_v23 = vadd.f32 %v574_v4, %v570_v26  ;;  %v577_v14 = vadd.f32 %v575_v46, %v571_v15  ;;  %v607_v5 = vadd.f32 %v605_v57, %v601_v42  ;;  %768 = vst.msk [vmem:[%s1565_s15 + $0x28] sm:$0xff] %vm429_vm3, %v490_v1 }
 0x1d9   : > { %v608_v11 = vadd.f32 %v606_v17, %v602_v8  ;;  %v638_v62 = vadd.f32 %v636_v24, %v632_v49  ;;  %v1720_v9 = vstv %s1305_s30  ;;  %v1722_v0 = vstv %s1330_s10  ;;  %774 = vst.msk [vmem:[%s1565_s15 + $0x30] sm:$0xff] %vm429_vm3, %v520_v44 }
 0x1da   : > { %v639_v30 = vadd.f32 %v637_v38, %v633_v28  ;;  %v549_v31 = vadd.f32 %v1720_v9, %v545_v34  ;;  %v1721_v2 = vmov %v1720_v9  ;;  %v580_v26 = vadd.f32 %v1722_v0, %v576_v23  ;;  %775 = vst.msk [vmem:[%s1565_s15 + $0x38] sm:$0xff] %vm429_vm3, %v521_v63 }
 0x1db   : > { %v550_v43 = vadd.f32 %v1721_v2, %v546_v19  ;;  %v1723_v15 = vmov %v1722_v0  ;;  %v1724_v42 = vstv %s1362_s12  ;;  %v1726_v36 = vstv %s1378_s19 }
 0x1dc   : > { %v581_v35 = vadd.f32 %v1723_v15, %v577_v14  ;;  %v611_v8 = vadd.f32 %v1724_v42, %v607_v5  ;;  %v1725_v49 = vmov %v1724_v42  ;;  %v551_v16 = vmax.f32 %v549_v31, 0.0 }
 0x1dd   : > { %v612_v28 = vadd.f32 %v1725_v49, %v608_v11  ;;  %v552_v6 = vmax.f32 %v550_v43, 0.0  ;;  %v582_v45 = vmax.f32 %v580_v26, 0.0  ;;  %v642_v10 = vadd.f32 %v1726_v36, %v638_v62 }
 0x1de   : > { %v583_v18 = vmax.f32 %v581_v35, 0.0  ;;  %v1727_v37 = vmov %v1726_v36  ;;  %781 = vst.msk [vmem:[%s1565_s15 + $0x40] sm:$0xff] %vm429_vm3, %v551_v16  ;;  %v613_v56 = vmax.f32 %v611_v8, 0.0 }
 0x1df   : > { %v643_v39 = vadd.f32 %v1727_v37, %v639_v30  ;;  %782 = vst.msk [vmem:[%s1565_s15 + $0x48] sm:$0xff] %vm429_vm3, %v552_v6  ;;  %v614_v40 = vmax.f32 %v612_v28, 0.0  ;;  %v644_v50 = vmax.f32 %v642_v10, 0.0 }
 0x1e0   : > { %788 = vst.msk [vmem:[%s1565_s15 + $0x50] sm:$0xff] %vm429_vm3, %v582_v45 }
 0x1e1   : > { %789 = vst.msk [vmem:[%s1565_s15 + $0x58] sm:$0xff] %vm429_vm3, %v583_v18  ;;  %v645_v51 = vmax.f32 %v643_v39, 0.0 }
 0x1e2   : > { %795 = vst.msk [vmem:[%s1565_s15 + $0x60] sm:$0xff] %vm429_vm3, %v613_v56 }
 0x1e3   : > { %796 = vst.msk [vmem:[%s1565_s15 + $0x68] sm:$0xff] %vm429_vm3, %v614_v40 }
 0x1e4   : > { %802 = vst.msk [vmem:[%s1565_s15 + $0x70] sm:$0xff] %vm429_vm3, %v644_v50 }
 0x1e5   : > { %803 = vst.msk [vmem:[%s1565_s15 + $0x78] sm:$0xff] %vm429_vm3, %v645_v51 }
 0x1e6 PF: > { %s1728_s15 = sld [smem:[#allocation14_spill]] }
 0x1e7   : > { %s1729_s12 = sld [smem:[#allocation11_spill]] }
 0x1e8   : > { %s1730_s13 = sld [smem:[#allocation12_spill]] }
 0x1e9   : > { %s1731_s14 = sld [smem:[#allocation15_spill]] }
 0x1ec   : > { %p15_p8 = scmp.ge.s32.totalorder %s1728_s15, 4  }
 0x1ee   :  { %17 = sbr.rel (!%p15_p8) target bundleno = 10 (0xa), region = 88 }
 0x1f3   :  { %670 = vsyncpa [#allocation3], 1 }
 0x1f4   :  { %672 = vsyncpa [#allocation3 + $0x1], 1 }
 0x1f5   :  { %673 = vsyncpa [#allocation4], 1 }
 0x1f6   :  { %675 = vsyncpa [#allocation4 + $0x1], 1 }
 0x1f7   :  { %676 = vsyncpa [#allocation7], 1 }

</bundles_post_ra>
